<compile_context>
chip_gen: v7x
topology: tpu7x:2x2x1
jax: 0.10.0
libtpu: 0.0.40
codegen_flags: <defaults>
</compile_context>

<pallas_src>
import jax
import jax.numpy as jnp
from jax.experimental import pallas as pl
from jax.experimental.pallas import tpu as pltpu


def _round_up(x, m):
    return (x + m - 1) // m * m


def _pick_toh(oh, ow, n, cp):
    """Output-row tile so TM = TOH*OW hits the per-C target and grid >= 2 (v7x)."""
    if cp <= 128:
        tm_target = 2048
    elif cp <= 256:
        tm_target = 1024
    else:
        tm_target = 512
    toh = max(1, min(oh, tm_target // max(ow, 1)))
    nblk = pl.cdiv(oh, toh)
    if n * nblk < 2 and oh >= 2:       # keep both v7x TensorCores busy
        nblk = 2
    return pl.cdiv(oh, nblk)           # balance blocks -> minimal OH padding


def _downsample_kernel(xm_ref, xh_ref, w_ref, b_ref, o_ref, slab_ref):
    # xm_ref: (2*TOH, OW+1, 2*Cp) bf16   input rows owned by this block
    # xh_ref: (1,     OW+1, 2*Cp) bf16   halo row (input row 2*TOH*(i+1))
    # w_ref : (9*Cp, Coutp)       bf16   (kh,kw,cin)-major flattened weights
    # b_ref : (1, Coutp)          f32
    # o_ref : (TOH, OW, Coutp)    out_dtype
    # slab  : (TOH*OW, 9*Cp)      bf16   VMEM im2col scratch
    toh2, owp1, c2 = xm_ref.shape
    toh = toh2 // 2
    ow = owp1 - 1
    cp = c2 // 2
    tm = toh * ow

    # Row-pair view: xm[t, p] == local input row 2*t + p  (free reshape, outer dims only).
    xm = xm_ref[...].reshape(toh, 2, owp1, c2)
    xh = xh_ref[...]                                     # (1, OW+1, 2*Cp)

    rows = (
        xm[:, 0],                                        # kh = 0: input rows 2t
        xm[:, 1],                                        # kh = 1: input rows 2t + 1
        xh if toh == 1                                   # kh = 2: input rows 2t + 2
        else jnp.concatenate([xm[1:, 0], xh], axis=0),
    )

    # Column-pair layout: pair p = original cols (2p -> lanes [0:Cp], 2p+1 -> [Cp:2Cp]).
    # Build the (TM, 9*Cp) im2col slab; every slice is unit-stride / 128-lane aligned.
    for kh in range(3):
        r = rows[kh]
        base = 3 * kh
        slab_ref[:, (base + 0) * cp:(base + 1) * cp] = r[:, :ow, :cp].reshape(tm, cp)  # kw=0
        slab_ref[:, (base + 1) * cp:(base + 2) * cp] = r[:, :ow, cp:].reshape(tm, cp)  # kw=1
        slab_ref[:, (base + 2) * cp:(base + 3) * cp] = r[:, 1:, :cp].reshape(tm, cp)   # kw=2

    # Single K = 9*Cp matmul: the MXU does all 9-tap accumulation internally.
    acc = jnp.dot(slab_ref[...], w_ref[...], preferred_element_type=jnp.float32)
    acc = acc + b_ref[...]
    o_ref[...] = acc.reshape(toh, ow, -1).astype(o_ref.dtype)


def downsample(x, weight_oihw, bias, *, data_format="NCHW",
               compute_dtype=jnp.bfloat16, out_dtype=None):
    """Forward pass of the VAE Downsample block.

    x:            (N, C, H, W) if data_format == "NCHW" (PyTorch interface),
                  (N, H, W, C) if data_format == "NHWC" (skips layout passes).
    weight_oihw:  (Cout, Cin, 3, 3)   torch Conv2d layout
    bias:         (Cout,)
    returns:      (N, Cout, H//2, W//2)  or  (N, H//2, W//2, Cout) for NHWC.

    compute_dtype=bf16 (MXU-native) with f32 accumulation is the default
    precision mode; pass compute_dtype=jnp.float32 for exact-conv numerics.
    """
    if data_format == "NCHW":
        n, c, h, w = x.shape
        x_nhwc = jnp.transpose(x, (0, 2, 3, 1))
    elif data_format == "NHWC":
        n, h, w, c = x.shape
        x_nhwc = x
    else:
        raise ValueError(f"unknown data_format {data_format!r}")

    cout, cin = weight_oihw.shape[0], weight_oihw.shape[1]
    assert cin == c, (cin, c)
    if out_dtype is None:
        out_dtype = x.dtype

    # pad (0,1,0,1) + conv(k=3, s=2, p=0)
    oh, ow = h // 2, w // 2

    # Lane-dense channel padding (sliced off at the end).
    cp = _round_up(c, 128)
    coutp = _round_up(cout, 128)

    toh = _pick_toh(oh, ow, n, cp)
    ohpad = _round_up(oh, toh)
    nblk = ohpad // toh

    hpad2 = 2 * ohpad + 1          # rows needed: 2*(ohpad-1)+3 (row >= h is zero pad)
    wpad2 = 2 * (ow + 1)           # cols needed: 2*(ow-1)+3, rounded to an even count

    # One fused layout pass: (transpose +) pad + cast; the column-pair reshape is a
    # bitcast (row-major layout unchanged).
    x_prep = jnp.pad(x_nhwc, ((0, 0), (0, hpad2 - h), (0, wpad2 - w), (0, cp - c)))
    x_prep = x_prep.astype(compute_dtype).reshape(n, hpad2, ow + 1, 2 * cp)

    # weight (O, I, kh, kw) -> (kh*3+kw, I, O) -> flat (9*Cp, Coutp), zero-padded, bf16.
    w9 = jnp.transpose(weight_oihw, (2, 3, 1, 0)).reshape(9, c, cout)
    w9 = jnp.pad(w9, ((0, 0), (0, cp - c), (0, coutp - cout)))
    w_flat = w9.reshape(9 * cp, coutp).astype(compute_dtype)
    b2d = jnp.pad(bias, (0, coutp - cout)).reshape(1, coutp).astype(jnp.float32)

    comp_bytes = jnp.dtype(compute_dtype).itemsize
    out_bytes = jnp.dtype(out_dtype).itemsize
    cost = pl.CostEstimate(
        flops=2 * n * ohpad * ow * 9 * cp * coutp,
        transcendentals=0,
        bytes_accessed=int(
            n * nblk * (2 * toh + 1) * (ow + 1) * 2 * cp * comp_bytes  # x (main + halo)
            + 9 * cp * coutp * comp_bytes                              # weights
            + coutp * 4                                                # bias
            + n * ohpad * ow * coutp * out_bytes                       # output
        ),
    )

    # (weights/bias use a constant index map and stay VMEM-resident; if VMEM ever
    #  gets tight, pipeline_mode=pl.Buffered(1) on them drops their second buffer.)
    out4 = pl.pallas_call(
        _downsample_kernel,
        out_shape=jax.ShapeDtypeStruct((n, ohpad, ow, coutp), out_dtype),
        grid=(n, nblk),
        in_specs=[
            # rows [2*toh*i, 2*toh*(i+1)) of image n
            pl.BlockSpec((None, 2 * toh, ow + 1, 2 * cp), lambda nn, i: (nn, i, 0, 0)),
            # halo row 2*toh*(i+1) of image n (same array, second window)
            pl.BlockSpec((None, 1, ow + 1, 2 * cp),
                         lambda nn, i: (nn, 2 * toh * (i + 1), 0, 0)),
            pl.BlockSpec((9 * cp, coutp), lambda nn, i: (0, 0)),   # weights: resident
            pl.BlockSpec((1, coutp), lambda nn, i: (0, 0)),        # bias: resident
        ],
        out_specs=pl.BlockSpec((None, toh, ow, coutp), lambda nn, i: (nn, i, 0, 0)),
        scratch_shapes=[pltpu.VMEM((toh * ow, 9 * cp), compute_dtype)],
        compiler_params=pltpu.CompilerParams(
            dimension_semantics=("parallel", "parallel"),
            vmem_limit_bytes=48 * 1024 * 1024,
        ),
        cost_estimate=cost,
    )(x_prep, x_prep, w_flat, b2d)

    out = out4[:, :oh, :, :cout]            # drop padded rows / channels
    if data_format == "NCHW":
        out = jnp.transpose(out, (0, 3, 1, 2))
    return out


def _reference(x_nchw, weight_oihw, bias, operand_dtype=jnp.float32):
    y = jax.lax.conv_general_dilated(
        x_nchw.astype(operand_dtype),
        weight_oihw.astype(operand_dtype),
        window_strides=(2, 2),
        padding=((0, 1), (0, 1)),
        dimension_numbers=("NCHW", "OIHW", "NCHW"),
        preferred_element_type=jnp.float32,
    )
    return y + bias.reshape(1, -1, 1, 1)


if __name__ == "__main__":
    key = jax.random.PRNGKey(0)
    k_x, k_w, k_b = jax.random.split(key, 3)

    N, C, H, W = 2, 4, 16, 16
    x = jax.random.normal(k_x, (N, C, H, W), dtype=jnp.float32)

    # Deterministic synthetic Conv2d(in=C, out=C, k=3) parameters.
    fan_in = C * 3 * 3
    bound = 1.0 / jnp.sqrt(jnp.float32(fan_in))
    weight = jax.random.uniform(k_w, (C, C, 3, 3), jnp.float32, -bound, bound)
    bias = jax.random.uniform(k_b, (C,), jnp.float32, -bound, bound)

    out = jax.jit(downsample)(x, weight, bias)
    out = jax.block_until_ready(out)

    assert out.shape == (N, C, H // 2, W // 2), out.shape

    # Tight check vs a reference using the same bf16 operands / f32 accumulation.
    ref_bf16 = _reference(x, weight, bias, jnp.bfloat16)
    assert jnp.allclose(out, ref_bf16, rtol=1e-4, atol=1e-4), "mismatch vs bf16 reference conv"

    # Loose check vs the full-f32 reference (only bf16 operand rounding differs).
    ref_f32 = _reference(x, weight, bias, jnp.float32)
    assert jnp.allclose(out, ref_f32, rtol=3e-2, atol=3e-2), "mismatch vs f32 reference conv"

    print("KERNEL_OK")
</pallas_src>

<mosaic_0001>
module attributes {stable_mosaic.version = 11 : i64} {
  func.func @_downsample_kernel(%arg0: i32, %arg1: i32, %arg2: memref<1x16x9x256xbf16, #tpu.memory_space<vmem>>, %arg3: memref<1x1x9x256xbf16, #tpu.memory_space<vmem>>, %arg4: memref<1152x128xbf16, #tpu.memory_space<vmem>>, %arg5: memref<1x128xf32, #tpu.memory_space<vmem>>, %arg6: memref<1x8x8x128xf32, #tpu.memory_space<vmem>>, %arg7: memref<64x1152xbf16, #tpu.memory_space<vmem>>) attributes {dimension_semantics = [#tpu.dimension_semantics<parallel>, #tpu.dimension_semantics<parallel>], iteration_bounds = array<i64: 2, 1>, scalar_prefetch = 0 : i64, scratch_operands = 1 : i64, tpu.core_type = #tpu.core_type<tc>, window_params = [{transform_indices = @transform_0, window_bounds = array<i64: 1, 16, 9, 256>}, {transform_indices = @transform_1, window_bounds = array<i64: 1, 1, 9, 256>}, {pipeline_mode = #tpu.pipeline_mode<synchronous>, transform_indices = @transform_2, window_bounds = array<i64: 1152, 128>}, {pipeline_mode = #tpu.pipeline_mode<synchronous>, transform_indices = @transform_3, window_bounds = array<i64: 1, 128>}, {transform_indices = @transform_4, window_bounds = array<i64: 1, 8, 8, 128>}]} {
    %c0 = arith.constant 0 : index
    %c0_0 = arith.constant 0 : index
    %c0_1 = arith.constant 0 : index
    %c0_2 = arith.constant 0 : index
    %0 = vector.load %arg2[%c0, %c0_0, %c0_1, %c0_2] : memref<1x16x9x256xbf16, #tpu.memory_space<vmem>>, vector<1x16x9x256xbf16>
    %1 = vector.shape_cast %0 : vector<1x16x9x256xbf16> to vector<16x9x256xbf16>
    %2 = vector.shape_cast %1 : vector<16x9x256xbf16> to vector<8x2x9x256xbf16>
    %c0_3 = arith.constant 0 : index
    %c0_4 = arith.constant 0 : index
    %c0_5 = arith.constant 0 : index
    %c0_6 = arith.constant 0 : index
    %3 = vector.load %arg3[%c0_3, %c0_4, %c0_5, %c0_6] : memref<1x1x9x256xbf16, #tpu.memory_space<vmem>>, vector<1x1x9x256xbf16>
    %4 = vector.shape_cast %3 : vector<1x1x9x256xbf16> to vector<1x9x256xbf16>
    %5 = vector.extract_strided_slice %2 {offsets = [0, 0, 0, 0], sizes = [8, 1, 9, 256], strides = [1, 1, 1, 1]} : vector<8x2x9x256xbf16> to vector<8x1x9x256xbf16>
    %6 = vector.shape_cast %5 : vector<8x1x9x256xbf16> to vector<8x9x256xbf16>
    %7 = vector.extract_strided_slice %2 {offsets = [0, 1, 0, 0], sizes = [8, 1, 9, 256], strides = [1, 1, 1, 1]} : vector<8x2x9x256xbf16> to vector<8x1x9x256xbf16>
    %8 = vector.shape_cast %7 : vector<8x1x9x256xbf16> to vector<8x9x256xbf16>
    %9 = vector.extract_strided_slice %2 {offsets = [1, 0, 0, 0], sizes = [7, 1, 9, 256], strides = [1, 1, 1, 1]} : vector<8x2x9x256xbf16> to vector<7x1x9x256xbf16>
    %10 = vector.shape_cast %9 : vector<7x1x9x256xbf16> to vector<7x9x256xbf16>
    %11 = tpu.concatenate %10, %4 in 0 : vector<7x9x256xbf16>, vector<1x9x256xbf16> -> vector<8x9x256xbf16>
    %12 = vector.extract_strided_slice %6 {offsets = [0, 0, 0], sizes = [8, 8, 128], strides = [1, 1, 1]} : vector<8x9x256xbf16> to vector<8x8x128xbf16>
    %13 = vector.shape_cast %12 : vector<8x8x128xbf16> to vector<64x128xbf16>
    %c0_7 = arith.constant 0 : index
    %c0_8 = arith.constant 0 : index
    %14 = vector.load %arg7[%c0_7, %c0_8] : memref<64x1152xbf16, #tpu.memory_space<vmem>>, vector<64x128xbf16>
    tpu.vector_store %arg7[%c0_7, %c0_8], %13 {strides = array<i32>} : memref<64x1152xbf16, #tpu.memory_space<vmem>>, vector<64x128xbf16>,
    %15 = vector.extract_strided_slice %6 {offsets = [0, 0, 128], sizes = [8, 8, 128], strides = [1, 1, 1]} : vector<8x9x256xbf16> to vector<8x8x128xbf16>
    %16 = vector.shape_cast %15 : vector<8x8x128xbf16> to vector<64x128xbf16>
    %c0_9 = arith.constant 0 : index
    %c128 = arith.constant 128 : index
    %17 = vector.load %arg7[%c0_9, %c128] : memref<64x1152xbf16, #tpu.memory_space<vmem>>, vector<64x128xbf16>
    tpu.vector_store %arg7[%c0_9, %c128], %16 {strides = array<i32>} : memref<64x1152xbf16, #tpu.memory_space<vmem>>, vector<64x128xbf16>,
    %18 = vector.extract_strided_slice %6 {offsets = [0, 1, 0], sizes = [8, 8, 128], strides = [1, 1, 1]} : vector<8x9x256xbf16> to vector<8x8x128xbf16>
    %19 = vector.shape_cast %18 : vector<8x8x128xbf16> to vector<64x128xbf16>
    %c0_10 = arith.constant 0 : index
    %c256 = arith.constant 256 : index
    %20 = vector.load %arg7[%c0_10, %c256] : memref<64x1152xbf16, #tpu.memory_space<vmem>>, vector<64x128xbf16>
    tpu.vector_store %arg7[%c0_10, %c256], %19 {strides = array<i32>} : memref<64x1152xbf16, #tpu.memory_space<vmem>>, vector<64x128xbf16>,
    %21 = vector.extract_strided_slice %8 {offsets = [0, 0, 0], sizes = [8, 8, 128], strides = [1, 1, 1]} : vector<8x9x256xbf16> to vector<8x8x128xbf16>
    %22 = vector.shape_cast %21 : vector<8x8x128xbf16> to vector<64x128xbf16>
    %c0_11 = arith.constant 0 : index
    %c384 = arith.constant 384 : index
    %23 = vector.load %arg7[%c0_11, %c384] : memref<64x1152xbf16, #tpu.memory_space<vmem>>, vector<64x128xbf16>
    tpu.vector_store %arg7[%c0_11, %c384], %22 {strides = array<i32>} : memref<64x1152xbf16, #tpu.memory_space<vmem>>, vector<64x128xbf16>,
    %24 = vector.extract_strided_slice %8 {offsets = [0, 0, 128], sizes = [8, 8, 128], strides = [1, 1, 1]} : vector<8x9x256xbf16> to vector<8x8x128xbf16>
    %25 = vector.shape_cast %24 : vector<8x8x128xbf16> to vector<64x128xbf16>
    %c0_12 = arith.constant 0 : index
    %c512 = arith.constant 512 : index
    %26 = vector.load %arg7[%c0_12, %c512] : memref<64x1152xbf16, #tpu.memory_space<vmem>>, vector<64x128xbf16>
    tpu.vector_store %arg7[%c0_12, %c512], %25 {strides = array<i32>} : memref<64x1152xbf16, #tpu.memory_space<vmem>>, vector<64x128xbf16>,
    %27 = vector.extract_strided_slice %8 {offsets = [0, 1, 0], sizes = [8, 8, 128], strides = [1, 1, 1]} : vector<8x9x256xbf16> to vector<8x8x128xbf16>
    %28 = vector.shape_cast %27 : vector<8x8x128xbf16> to vector<64x128xbf16>
    %c0_13 = arith.constant 0 : index
    %c640 = arith.constant 640 : index
    %29 = vector.load %arg7[%c0_13, %c640] : memref<64x1152xbf16, #tpu.memory_space<vmem>>, vector<64x128xbf16>
    tpu.vector_store %arg7[%c0_13, %c640], %28 {strides = array<i32>} : memref<64x1152xbf16, #tpu.memory_space<vmem>>, vector<64x128xbf16>,
    %30 = vector.extract_strided_slice %11 {offsets = [0, 0, 0], sizes = [8, 8, 128], strides = [1, 1, 1]} : vector<8x9x256xbf16> to vector<8x8x128xbf16>
    %31 = vector.shape_cast %30 : vector<8x8x128xbf16> to vector<64x128xbf16>
    %c0_14 = arith.constant 0 : index
    %c768 = arith.constant 768 : index
    %32 = vector.load %arg7[%c0_14, %c768] : memref<64x1152xbf16, #tpu.memory_space<vmem>>, vector<64x128xbf16>
    tpu.vector_store %arg7[%c0_14, %c768], %31 {strides = array<i32>} : memref<64x1152xbf16, #tpu.memory_space<vmem>>, vector<64x128xbf16>,
    %33 = vector.extract_strided_slice %11 {offsets = [0, 0, 128], sizes = [8, 8, 128], strides = [1, 1, 1]} : vector<8x9x256xbf16> to vector<8x8x128xbf16>
    %34 = vector.shape_cast %33 : vector<8x8x128xbf16> to vector<64x128xbf16>
    %c0_15 = arith.constant 0 : index
    %c896 = arith.constant 896 : index
    %35 = vector.load %arg7[%c0_15, %c896] : memref<64x1152xbf16, #tpu.memory_space<vmem>>, vector<64x128xbf16>
    tpu.vector_store %arg7[%c0_15, %c896], %34 {strides = array<i32>} : memref<64x1152xbf16, #tpu.memory_space<vmem>>, vector<64x128xbf16>,
    %36 = vector.extract_strided_slice %11 {offsets = [0, 1, 0], sizes = [8, 8, 128], strides = [1, 1, 1]} : vector<8x9x256xbf16> to vector<8x8x128xbf16>
    %37 = vector.shape_cast %36 : vector<8x8x128xbf16> to vector<64x128xbf16>
    %c0_16 = arith.constant 0 : index
    %c1024 = arith.constant 1024 : index
    %38 = vector.load %arg7[%c0_16, %c1024] : memref<64x1152xbf16, #tpu.memory_space<vmem>>, vector<64x128xbf16>
    tpu.vector_store %arg7[%c0_16, %c1024], %37 {strides = array<i32>} : memref<64x1152xbf16, #tpu.memory_space<vmem>>, vector<64x128xbf16>,
    %c0_17 = arith.constant 0 : index
    %c0_18 = arith.constant 0 : index
    %39 = vector.load %arg7[%c0_17, %c0_18] : memref<64x1152xbf16, #tpu.memory_space<vmem>>, vector<64x1152xbf16>
    %c0_19 = arith.constant 0 : index
    %c0_20 = arith.constant 0 : index
    %40 = vector.load %arg4[%c0_19, %c0_20] : memref<1152x128xbf16, #tpu.memory_space<vmem>>, vector<1152x128xbf16>
    %cst = arith.constant dense<0.000000e+00> : vector<64x128xf32>
    %41 = tpu.matmul %39, %40, %cst {dimension_numbers = #tpu.dot_dimension_numbers<[1], [0], [0], [1], [0, 0, 1, 1], [], []>} : vector<64x1152xbf16>, vector<1152x128xbf16>, vector<64x128xf32> -> vector<64x128xf32>
    %c0_21 = arith.constant 0 : index
    %c0_22 = arith.constant 0 : index
    %42 = vector.load %arg5[%c0_21, %c0_22] : memref<1x128xf32, #tpu.memory_space<vmem>>, vector<1x128xf32>
    %43 = vector.broadcast %42 : vector<1x128xf32> to vector<64x128xf32>
    %44 = arith.addf %41, %43 : vector<64x128xf32>
    %45 = vector.shape_cast %44 : vector<64x128xf32> to vector<8x8x128xf32>
    %c0_23 = arith.constant 0 : index
    %c0_24 = arith.constant 0 : index
    %c0_25 = arith.constant 0 : index
    %c0_26 = arith.constant 0 : index
    %46 = vector.load %arg6[%c0_23, %c0_24, %c0_25, %c0_26] : memref<1x8x8x128xf32, #tpu.memory_space<vmem>>, vector<1x8x8x128xf32>
    %47 = vector.shape_cast %46 : vector<1x8x8x128xf32> to vector<8x8x128xf32>
    %48 = vector.shape_cast %45 : vector<8x8x128xf32> to vector<1x8x8x128xf32>
    tpu.vector_store %arg6[%c0_23, %c0_24, %c0_25, %c0_26], %48 {strides = array<i32>} : memref<1x8x8x128xf32, #tpu.memory_space<vmem>>, vector<1x8x8x128xf32>,
    return
  }
  func.func @transform_0(%arg0: i32, %arg1: i32) -> (i32, i32, i32, i32) {
    %c0_i32 = arith.constant 0 : i32
    %c0_i32_0 = arith.constant 0 : i32
    %c0_i32_1 = arith.constant 0 : i32
    return %arg0, %arg1, %c0_i32, %c0_i32_0 : i32, i32, i32, i32
  }
  func.func @transform_1(%arg0: i32, %arg1: i32) -> (i32, i32, i32, i32) {
    %c1_i32 = arith.constant 1 : i32
    %0 = arith.addi %arg1, %c1_i32 : i32
    %c16_i32 = arith.constant 16 : i32
    %1 = arith.muli %c16_i32, %0 : i32
    %c0_i32 = arith.constant 0 : i32
    %c0_i32_0 = arith.constant 0 : i32
    %c0_i32_1 = arith.constant 0 : i32
    return %arg0, %1, %c0_i32, %c0_i32_0 : i32, i32, i32, i32
  }
  func.func @transform_2(%arg0: i32, %arg1: i32) -> (i32, i32) {
    %c0_i32 = arith.constant 0 : i32
    %c0_i32_0 = arith.constant 0 : i32
    %c0_i32_1 = arith.constant 0 : i32
    return %c0_i32, %c0_i32_0 : i32, i32
  }
  func.func @transform_3(%arg0: i32, %arg1: i32) -> (i32, i32) {
    %c0_i32 = arith.constant 0 : i32
    %c0_i32_0 = arith.constant 0 : i32
    %c0_i32_1 = arith.constant 0 : i32
    return %c0_i32, %c0_i32_0 : i32, i32
  }
  func.func @transform_4(%arg0: i32, %arg1: i32) -> (i32, i32, i32, i32) {
    %c0_i32 = arith.constant 0 : i32
    %c0_i32_0 = arith.constant 0 : i32
    %c0_i32_1 = arith.constant 0 : i32
    return %arg0, %arg1, %c0_i32, %c0_i32_0 : i32, i32, i32, i32
  }
}

</mosaic_0001>

<bundles_post_ra>
// kernel: downsample.1
= control target key start
LH: loop header
LB: loop body
LE: loop exit
PB: predicated region body
PF: predicated region fallthrough
CT: control target
= control target key end

     0   :  { %s2333_s15 = smov 0   ;;  %s2335_s16 = smov 0   ;;  %s2891_s0 = inlined_call_operand.vmem [shape: bf16[2,17,9,256], index: 0, kind: input, shape index: {}, may-alias: {0,1}]   ;;  %s2892_s1 = inlined_call_operand.vmem [shape: bf16[2,17,9,256], index: 1, kind: input, shape index: {}, may-alias: {0,1}]   ;;  %s2893_s2 = inlined_call_operand.vmem [shape: bf16[1152,128], index: 2, kind: input, shape index: {}]   ;;  %s2894_s3 = inlined_call_operand.vmem [shape: f32[1,128], index: 3, kind: input, shape index: {}]   ;;  %s2895_s4 = inlined_call_operand.vmem [shape: f32[2,8,8,128], index: 4, kind: output, shape index: {}]  }
   0x1   :  { %s2337_s17 = smov 0  }
   0x2 LB: > { %s26_s18 = sadd.s32 1, %s2302_s16  ;;  %p1854_p0 = scmp.ge.s32.totalorder %s2306_s17, 1  ;;  %s2306_s17 = sphi %s2337_s17, %s14_s17   ;;  %s2302_s16 = sphi %s2335_s16, %s2899_s16   ;;  %s2298_s15 = sphi %s2333_s15, %s2898_s15  }
   0x3   : > { %p28_p1 = scmp.ge.s32.totalorder %s26_s18, 2  ;;  %p220_p2 = scmp.lt.s32.totalorder %s2306_s17, 3 }
   0x5   : > { %s2901_s18 = smov (%p28_p1, %s26_s18), 0  ;;  %p221_p3 = pnand %p1854_p0, %p220_p2 }
   0x6   : > { %v2212_v0 = vld [vmem:[%s2893_s2 + $0x40] sm:$0xff] (!%p221_p3)   ;;  %p279_p4 = scmp.lt.s32.totalorder (!%p221_p3), %s2298_s15, 1  ;;  %v2216_v4 = vld [vmem:[%s2893_s2 + $0x48] sm:$0xff] (!%p221_p3)   ;;  %v2220_v8 = vld [vmem:[%s2893_s2 + $0x50] sm:$0xff] (!%p221_p3)   ;;  %vm409_vm0 = vsmask.f32 (!%p221_p3), 3328 }
   0x7   : > { %224 = sbr.rel (%p221_p3) target bundleno = 327 (0x147), region = 36  ;;  %v2213_v1 = vld [vmem:[%s2893_s2 + $0xc0] sm:$0xff] (!%p221_p3)   ;;  %1973 = vmatprep.subr.bf16.mxu0 (!%p221_p3), %v2212_v0  ;;  %v2217_v5 = vld [vmem:[%s2893_s2 + $0xc8] sm:$0xff] (!%p221_p3)   ;;  %v2221_v9 = vld [vmem:[%s2893_s2 + $0xd0] sm:$0xff] (!%p221_p3)   ;;  %vm410_vm1 = vsmask.f32 (!%p221_p3), 7440 }
   0x8   : > { %v2214_v2 = vld [vmem:[%s2893_s2] sm:$0xff] (!%p221_p3)   ;;  %2013 = vmatprep.subr.bf16.mxu1 (!%p221_p3), %v2213_v1  ;;  %v2218_v6 = vld [vmem:[%s2893_s2 + $0x8] sm:$0xff] (!%p221_p3)   ;;  %v2222_v10 = vld [vmem:[%s2893_s2 + $0x10] sm:$0xff] (!%p221_p3)  }
   0x9   : > { %v2215_v3 = vld [vmem:[%s2893_s2 + $0x80] sm:$0xff] (!%p221_p3)   ;;  %1974 = vmatpush3.bf16.msra.mxu0 (!%p221_p3), %v2214_v2  ;;  %v2219_v7 = vld [vmem:[%s2893_s2 + $0x88] sm:$0xff] (!%p221_p3)   ;;  %v2223_v11 = vld [vmem:[%s2893_s2 + $0x90] sm:$0xff] (!%p221_p3)  }
   0xa   : > { %2014 = vmatpush3.bf16.msra.mxu1 (!%p221_p3), %v2215_v3  ;;  %1975 = vmatprep.subr.bf16.mxu0 (!%p221_p3), %v2216_v4  ;;  %v2224_v12 = vld [vmem:[%s2893_s2 + $0x58] sm:$0xff] (!%p221_p3)   ;;  %v2228_v16 = vld [vmem:[%s2893_s2 + $0x60] sm:$0xff] (!%p221_p3)   ;;  %v2232_v20 = vld [vmem:[%s2893_s2 + $0x68] sm:$0xff] (!%p221_p3)  }
   0xb   : > { %2015 = vmatprep.subr.bf16.mxu1 (!%p221_p3), %v2217_v5  ;;  %v2225_v13 = vld [vmem:[%s2893_s2 + $0xd8] sm:$0xff] (!%p221_p3)   ;;  %v2229_v17 = vld [vmem:[%s2893_s2 + $0xe0] sm:$0xff] (!%p221_p3)   ;;  %v2233_v21 = vld [vmem:[%s2893_s2 + $0xe8] sm:$0xff] (!%p221_p3)  }
   0xc   : > { %v2226_v14 = vld [vmem:[%s2893_s2 + $0x18] sm:$0xff] (!%p221_p3)   ;;  %v2230_v18 = vld [vmem:[%s2893_s2 + $0x20] sm:$0xff] (!%p221_p3)   ;;  %v2234_v22 = vld [vmem:[%s2893_s2 + $0x28] sm:$0xff] (!%p221_p3)  }
   0xd   : > { %1976 = vmatpush3.bf16.msra.mxu0 (!%p221_p3), %v2218_v6  ;;  %v2227_v15 = vld [vmem:[%s2893_s2 + $0x98] sm:$0xff] (!%p221_p3)   ;;  %v2231_v19 = vld [vmem:[%s2893_s2 + $0xa0] sm:$0xff] (!%p221_p3)   ;;  %v2235_v23 = vld [vmem:[%s2893_s2 + $0xa8] sm:$0xff] (!%p221_p3)  }
   0xe   : > { %s2903_s15 = smov (!%p279_p4, %s2298_s15), 1  ;;  %2016 = vmatpush3.bf16.msra.mxu1 %v2219_v7  ;;  %1977 = vmatprep.subr.bf16.mxu0 %v2220_v8  ;;  %v2236_v24 = vld [vmem:[%s2893_s2 + $0x70] sm:$0xff]   ;;  %v2240_v28 = vld [vmem:[%s2893_s2 + $0x78] sm:$0xff]   ;;  %v2244_v40 = vld [vmem:[%s2893_s2 + $0x140] sm:$0xff]  }
   0xf   : > { %2017 = vmatprep.subr.bf16.mxu1 %v2221_v9  ;;  %v2237_v25 = vld [vmem:[%s2893_s2 + $0xf0] sm:$0xff]   ;;  %s2185_s27 = smul.u32 272, %s2903_s15  ;;  %v2241_v29 = vld [vmem:[%s2893_s2 + $0xf8] sm:$0xff]   ;;  %v2245_v44 = vld [vmem:[%s2893_s2 + $0x1c0] sm:$0xff]   ;;  %s1972_s23 = sshll.u32 %s2903_s15, 6 }
  0x10   : > { %v2238_v26 = vld [vmem:[%s2893_s2 + $0x30] sm:$0xff]   ;;  %v2242_v30 = vld [vmem:[%s2893_s2 + $0x38] sm:$0xff]   ;;  %v2246_v52 = vld [vmem:[%s2893_s2 + $0x100] sm:$0xff]   ;;  %s316_s26 = scalar_lea.vmem %s2895_s4, %s1972_s23 }
  0x11   : > { %1978 = vmatpush3.bf16.msra.mxu0 %v2222_v10  ;;  %v2239_v27 = vld [vmem:[%s2893_s2 + $0xb0] sm:$0xff]   ;;  %s2449_s12 = scalar_lea.vmem %s2891_s0, %s2185_s27  ;;  %v2243_v31 = vld [vmem:[%s2893_s2 + $0xb8] sm:$0xff]   ;;  %v2248_v57 = vld [vmem:[%s2893_s2 + $0x148] sm:$0xff]   ;;  %s2596_s6 = sadd.s32 256, %s2185_s27 }
  0x12   : > { %2018 = vmatpush3.bf16.msra.mxu1 %v2223_v11  ;;  %1979 = vmatprep.subr.bf16.mxu0 %v2224_v12  ;;  %v319_v32 = vld [vmem:[%s2449_s12] sm:$0xff]  ;;  %v2462_v34 = vld [vmem:[%s2449_s12 + $0x10] sm:$0xff]  ;;  %v320_v49 = vld [vmem:[%s2449_s12 + $0x8] sm:$0x11]  ;;  %s305_s27 = scalar_lea.vmem %s2892_s1, %s2596_s6 }
  0x13   : > { %2019 = vmatprep.subr.bf16.mxu1 %v2225_v13  ;;  %v2459_v33 = vld [vmem:[%s2449_s12 + $0x20] sm:$0xff]  ;;  %v381_v35 = vrot.slane %v319_v32, 4  ;;  %v413_v37 = vshrl.u32 %v319_v32, 16  ;;  %v416_v38 = vshll.u32 %v319_v32, 16  ;;  %v2466_v39 = vld [vmem:[%s2449_s12 + $0x30] sm:$0xff]  ;;  %v572_v42 = vrot.slane %v2462_v34, 4  ;;  %vm2498_vm2 = vmor %vm409_vm0, %vm410_vm1 }
  0x14   : > { %v382_v36 = vrot.slane %v2459_v33, 4  ;;  %v1871_v41 = vcombine.low %v2462_v34, %v2466_v39  ;;  %v601_v43 = vshrl.u32 %v2462_v34, 16  ;;  %v573_v48 = vrot.slane %v2466_v39, 4  ;;  %v324_v51 = vld [vmem:[%s2449_s12 + $0x28] sm:$0x11]  ;;  %v2514_v12 = vld [vmem:[%s2449_s12 + $0x40] sm:$0xff] }
  0x15   : > { %1980 = vmatpush3.bf16.msra.mxu0 %v2226_v14  ;;  %v415_v46 = vrot.slane %v413_v37, 4  ;;  %v418_v47 = vrot.slane %v416_v38, 5  ;;  %v604_v50 = vshll.u32 %v2462_v34, 16  ;;  %v615_v54 = vshrl.u32 %v2466_v39, 16  ;;  %v2250_v7 = vld [vmem:[%s2893_s2 + $0x108] sm:$0xff]   ;;  %v2517_v13 = vld [vmem:[%s2449_s12 + $0x60] sm:$0xff] }
  0x16   : > { %2020 = vmatpush3.bf16.msra.mxu1 %v2227_v15  ;;  %1981 = vmatprep.subr.bf16.mxu0 %v2228_v16  ;;  %v1863_v45 = vcombine.low %v381_v35, %v382_v36  ;;  %v2487_v53 = vrot.slane %v601_v43, 4  ;;  %v1859_v55 = vcombine.low %v319_v32, %v2459_v33  ;;  %v422_v58 = vshll.u32 %v320_v49, 16  ;;  %v2522_v16 = vld [vmem:[%s2449_s12 + $0x50] sm:$0xff] }
  0x17   : > { %2021 = vmatprep.subr.bf16.mxu1 %v2229_v17  ;;  %1503 = vmatprep.mubr.bf16.mxu1 %v1871_v41  ;;  %v419_v56 = vor.u32 %v418_v47, %v415_v46  ;;  %v427_v59 = vshrl.u32 %v2459_v33, 16  ;;  %v618_v60 = vshll.u32 %v2466_v39, 16  ;;  %v430_v62 = vshll.u32 %v2459_v33, 16  ;;  %v2525_v17 = vld [vmem:[%s2449_s12 + $0x70] sm:$0xff]  ;;  %v330_v39 = vld [vmem:[%s2449_s12 + $0x58] sm:$0x11] }
  0x18   : > { %1438 = vmatprep.mubr.bf16.mxu0 %v1863_v45  ;;  %v436_v63 = vshll.u32 %v324_v51, 16  ;;  %v424_v0 = vrot.slane %v422_v58, 5  ;;  %v2502_v6 = vrot.slane %v604_v50, 5  ;;  %v2507_v8 = vrot.slane %v615_v54, 4  ;;  %v2253_v50 = vld [vmem:[%s2893_s2 + $0x1d0] sm:$0xff]  }
  0x19   : > { %1982 = vmatpush3.bf16.msra.mxu0 %v2230_v18  ;;  %v420_v61 = vrot.slane %v419_v56, 4  ;;  %v429_v1 = vrot.slane %v427_v59, 4  ;;  %v432_v3 = vrot.slane %v430_v62, 5  ;;  %v2509_v9 = vrot.slane %v618_v60, 5  ;;  %v328_v18 = vld [vmem:[%s2449_s12 + $0x48] sm:$0x11] }
  0x1a   : > { %2022 = vmatpush3.bf16.msra.mxu1 %v2231_v19  ;;  %1983 = vmatprep.subr.bf16.mxu0 %v2232_v20  ;;  %v438_v4 = vrot.slane %v436_v63, 5  ;;  %v383_v14 = vrot.slane %v2514_v12, 4  ;;  %v384_v15 = vrot.slane %v2517_v13, 4  ;;  %v2247_v20 = vld [vmem:[%s2893_s2 + $0x180] sm:$0xff]   ;;  %v441_v32 = vshrl.u32 %v2514_v12, 16  ;;  %v2254_v51 = vld [vmem:[%s2893_s2 + $0x110] sm:$0xff]  }
  0x1b   : > { %2023 = vmatprep.subr.bf16.mxu1 %v2233_v21  ;;  %v433_v5 = vor.u32 %v432_v3, %v429_v1  ;;  %v425_v10 = vsel %vm2498_vm2, %v420_v61, %v424_v0  ;;  %v1872_v21 = vcombine.low %v2522_v16, %v2525_v17  ;;  %v444_v35 = vshll.u32 %v2514_v12, 16  ;;  %v2255_v54 = vld [vmem:[%s2893_s2 + $0x190] sm:$0xff]   ;;  %v2256_v59 = vld [vmem:[%s2893_s2 + $0x158] sm:$0xff]   ;;  %v2589_v0 = vld [vmem:[%s2449_s12 + $0x80] sm:$0xff] }
  0x1c   : > { %v450_v37 = vshll.u32 %v328_v18, 16  ;;  %v455_v38 = vshrl.u32 %v2517_v13, 16  ;;  %v646_v43 = vshll.u32 %v2525_v17, 16  ;;  %v621_v56 = vor.u32 %v2509_v9, %v2507_v8  ;;  %v2257_v61 = vld [vmem:[%s2893_s2 + $0x1d8] sm:$0xff]   ;;  %v2592_v1 = vld [vmem:[%s2449_s12 + $0xa0] sm:$0xff]  ;;  %v2611_v9 = vld [vmem:[%s2449_s12 + $0x90] sm:$0xff] }
  0x1d   : > { %1984 = vmatpush3.bf16.msra.mxu0 %v2234_v22  ;;  %v434_v11 = vrot.slane %v433_v5, 4  ;;  %v629_v22 = vshrl.u32 %v2522_v16, 16  ;;  %v446_v45 = vrot.slane %v444_v35, 5  ;;  %v386_v8 = vrot.slane %v2592_v1, 4 }
  0x1e   : > { %2024 = vmatpush3.bf16.msra.mxu1 %v2235_v23  ;;  %1985 = vmatprep.subr.bf16.mxu0 %v2236_v24  ;;  %v1860_v23 = vcombine.low %v2514_v12, %v2517_v13  ;;  %v332_v24 = vld [vmem:[%s2449_s12 + $0x68] sm:$0x11]  ;;  %v457_v46 = vrot.slane %v455_v38, 4  ;;  %v452_v47 = vrot.slane %v450_v37, 5  ;;  %v483_v35 = vshrl.u32 %v2592_v1, 16 }
  0x1f   : > { %2025 = vmatprep.subr.bf16.mxu1 %v2237_v25  ;;  %v2530_v19 = vsel %vm2498_vm2, %v434_v11, %v438_v4  ;;  %v464_v41 = vshll.u32 %v332_v24, 16  ;;  %v2600_v4 = vrot.slane %v621_v56, 4  ;;  %v2602_v5 = vrot.slane %v629_v22, 4  ;;  %v336_v11 = vld [vmem:[%s2449_s12 + $0x88] sm:$0x11] }
  0x20   : > { %v1867_v25 = vcombine.low %v425_v10, %v2530_v19  ;;  %v2614_v10 = vld [vmem:[%s2449_s12 + $0xb0] sm:$0xff]  ;;  %v1861_v22 = vcombine.low %v2589_v0, %v2592_v1  ;;  %v486_v37 = vshll.u32 %v2592_v1, 16 }
  0x21   : > { %1986 = vmatpush3.bf16.msra.mxu0 %v2238_v26  ;;  %v2249_v26 = vld [vmem:[%s2893_s2 + $0x1c8] sm:$0xff]   ;;  %v466_v58 = vrot.slane %v464_v41, 5  ;;  %v2261_v41 = vld [vmem:[%s2893_s2 + $0x1e0] sm:$0xff]  }
  0x22   : > { %2026 = vmatpush3.bf16.msra.mxu1 %v2239_v27  ;;  %1987 = vmatprep.subr.bf16.mxu0 %v2240_v28  ;;  %v1864_v27 = vcombine.low %v383_v14, %v384_v15  ;;  %v632_v28 = vshll.u32 %v2522_v16, 16 }
  0x23   : > { %2027 = vmatprep.subr.bf16.mxu1 %v2241_v29  ;;  %v643_v29 = vshrl.u32 %v2525_v17, 16 }
  0x24   : > { %v634_v24 = vrot.slane %v632_v28, 5  ;;  %v478_v28 = vshll.u32 %v336_v11, 16 }
  0x25   : > { %1988 = vmatpush3.bf16.msra.mxu0 %v2242_v30  ;;  %v2252_v30 = vld [vmem:[%s2893_s2 + $0x150] sm:$0xff]  }
  0x26   : > { %2028 = vmatpush3.bf16.msra.mxu1 %v2243_v31  ;;  %2053 = vmatprep.subr.bf16.mxu0 %v2244_v40  ;;  %v2251_v31 = vld [vmem:[%s2893_s2 + $0x188] sm:$0xff]   ;;  %v458_v40 = vshll.u32 %v2517_v13, 16 }
  0x27   : > { %2093 = vmatprep.subr.bf16.mxu1 %v2245_v44  ;;  %v443_v44 = vrot.slane %v441_v32, 4  ;;  %v472_v32 = vshll.u32 %v2589_v0, 16 }
  0x28   : > { %1439 = vmatmul.mubr.bf16.vlgmr.msra.gmra.mrb[0].mxu0 %v1859_v55  ;;  %v460_v49 = vrot.slane %v458_v40, 5  ;;  %v607_v55 = vor.u32 %v2502_v6, %v2487_v53  ;;  %v2258_v53 = vld [vmem:[%s2893_s2 + $0x118] sm:$0xff]  }
  0x29   : > { %2054 = vmatpush3.bf16.msra.mxu0 %v2246_v52  ;;  %1504 = vmatmul.mubr.bf16.vlgmr.msra.gmra.mrb[0].mxu1 %v1867_v25  ;;  %v447_v52 = vor.u32 %v446_v45, %v443_v44  ;;  %v480_v44 = vrot.slane %v478_v28, 5  ;;  %v485_v45 = vrot.slane %v483_v35, 4 }
  0x2a   : > { %2055 = vmatprep.subr.bf16.mxu0 %v2248_v57  ;;  %1446 = vmatprep.mubr.bf16.mxu0 %v1864_v27  ;;  %v461_v57 = vor.u32 %v460_v49, %v457_v46  ;;  %v2598_v3 = vrot.slane %v607_v55, 4  ;;  %v2260_v27 = vld [vmem:[%s2893_s2 + $0x160] sm:$0xff]   ;;  %v488_v46 = vrot.slane %v486_v37, 5 }
  0x2b   : > { %2094 = vmatpush3.bf16.msra.mxu1 %v2247_v20  ;;  %1511 = vmatprep.mubr.bf16.mxu1 %v1872_v21  ;;  %v448_v60 = vrot.slane %v447_v52, 4  ;;  %v2259_v20 = vld [vmem:[%s2893_s2 + $0x198] sm:$0xff]   ;;  %v1873_v21 = vcombine.low %v2611_v9, %v2614_v10  ;;  %v2263_v49 = vld [vmem:[%s2893_s2 + $0x1a0] sm:$0xff]   ;;  %v657_v52 = vshrl.u32 %v2611_v9, 16 }
  0x2c   : > { %2095 = vmatprep.subr.bf16.mxu1 %v2249_v26  ;;  %v462_v62 = vrot.slane %v461_v57, 4  ;;  %v469_v26 = vshrl.u32 %v2589_v0, 16  ;;  %v2265_v57 = vld [vmem:[%s2893_s2 + $0x1e8] sm:$0xff]  }
  0x2d   : > { %2056 = vmatpush3.bf16.msra.mxu0 %v2250_v7  ;;  %v2586_v63 = vsel %vm2498_vm2, %v448_v60, %v452_v47  ;;  %v385_v7 = vrot.slane %v2589_v0, 4 }
  0x2e   : > { %2057 = vmatprep.subr.bf16.mxu0 %v2252_v30  ;;  %v2606_v6 = vsel %vm2498_vm2, %v462_v62, %v466_v58  ;;  %v645_v30 = vrot.slane %v643_v29, 4  ;;  %v471_v38 = vrot.slane %v469_v26, 4  ;;  %v2262_v29 = vld [vmem:[%s2893_s2 + $0x120] sm:$0xff]   ;;  %v2266_v58 = vld [vmem:[%s2893_s2 + $0x128] sm:$0xff]   ;;  %v671_v62 = vshrl.u32 %v2614_v10, 16 }
  0x2f   : > { %2096 = vmatpush3.bf16.msra.mxu1 %v2251_v31  ;;  %v1868_v18 = vcombine.low %v2586_v63, %v2606_v6  ;;  %v1865_v25 = vcombine.low %v385_v7, %v386_v8  ;;  %v648_v31 = vrot.slane %v646_v43, 5  ;;  %v474_v43 = vrot.slane %v472_v32, 5  ;;  %v344_v26 = vld [vmem:[%s2449_s12 + $0xc8] sm:$0x11] }
  0x30   : > { %1447 = vmatmul.mubr.bf16.gmra.mrb[4].mxu0 %v1860_v23  ;;  %2097 = vmatprep.subr.bf16.mxu1 %v2253_v50  ;;  %v340_v23 = vld [vmem:[%s2449_s12 + $0xa8] sm:$0x11] }
  0x31   : > { %2058 = vmatpush3.bf16.msra.mxu0 %v2254_v51  ;;  %1512 = vmatmul.mubr.bf16.gmra.mrb[4].mxu1 %v1868_v18  ;;  %v492_v40 = vshll.u32 %v340_v23, 16  ;;  %v475_v50 = vor.u32 %v474_v43, %v471_v38  ;;  %v489_v51 = vor.u32 %v488_v46, %v485_v45  ;;  %v649_v60 = vor.u32 %v648_v31, %v645_v30  ;;  %v2674_v18 = vld [vmem:[%s2449_s12 + $0xc0] sm:$0xff]  ;;  %v348_v31 = vld [vmem:[%s2449_s12 + $0xe8] sm:$0x11] }
  0x32   : > { %2059 = vmatprep.subr.bf16.mxu0 %v2256_v59  ;;  %1454 = vmatprep.mubr.bf16.mxu0 %v1865_v25  ;;  %v635_v59 = vor.u32 %v634_v24, %v2602_v5  ;;  %v2267_v5 = vld [vmem:[%s2893_s2 + $0x1a8] sm:$0xff]   ;;  %v2688_v24 = vld [vmem:[%s2449_s12 + $0xd0] sm:$0xff]  ;;  %v2708_v38 = vld [vmem:[%s305_s27] sm:$0xff]  ;;  %v506_v43 = vshll.u32 %v344_v26, 16 }
  0x33   : > { %2098 = vmatpush3.bf16.msra.mxu1 %v2255_v54  ;;  %1519 = vmatprep.mubr.bf16.mxu1 %v1873_v21  ;;  %v494_v47 = vrot.slane %v492_v40, 5  ;;  %v2264_v54 = vld [vmem:[%s2893_s2 + $0x168] sm:$0xff]   ;;  %v476_v55 = vrot.slane %v475_v50, 4  ;;  %v490_v56 = vrot.slane %v489_v51, 4  ;;  %v2691_v25 = vld [vmem:[%s2449_s12 + $0xf0] sm:$0xff]  ;;  %v2700_v28 = vrot.slane %v649_v60, 4 }
  0x34   : > { %2099 = vmatprep.subr.bf16.mxu1 %v2257_v61  ;;  %v660_v61 = vshll.u32 %v2611_v9, 16  ;;  %v1874_v30 = vcombine.low %v2688_v24, %v2691_v25  ;;  %v2698_v32 = vrot.slane %v635_v59, 4  ;;  %v352_v40 = vld [vmem:[%s305_s27 + $0x8] sm:$0x11]  ;;  %v764_v50 = vshll.u32 %v2708_v38, 16  ;;  %v2268_v51 = vld [vmem:[%s2893_s2 + $0x170] sm:$0xff]  }
  0x35   : > { %2060 = vmatpush3.bf16.msra.mxu0 %v2258_v53  ;;  %v2664_v53 = vsel %vm2498_vm2, %v476_v55, %v480_v44  ;;  %v2668_v11 = vsel %vm2498_vm2, %v490_v56, %v494_v47  ;;  %v520_v47 = vshll.u32 %v348_v31, 16  ;;  %v508_v59 = vrot.slane %v506_v43, 5 }
  0x36   : > { %2061 = vmatprep.subr.bf16.mxu0 %v2260_v27  ;;  %v1869_v21 = vcombine.low %v2664_v53, %v2668_v11  ;;  %v674_v27 = vshll.u32 %v2614_v10, 16  ;;  %v699_v34 = vshrl.u32 %v2691_v25, 16 }
  0x37   : > { %2100 = vmatpush3.bf16.msra.mxu1 %v2259_v20  ;;  %v2677_v20 = vld [vmem:[%s2449_s12 + $0xe0] sm:$0xff]  ;;  %v522_v31 = vrot.slane %v520_v47, 5 }
  0x38   : > { %1455 = vmatmul.mubr.bf16.gmra.mrb[8].mxu0 %v1861_v22  ;;  %2101 = vmatprep.subr.bf16.mxu1 %v2261_v41  ;;  %v387_v22 = vrot.slane %v2674_v18, 4  ;;  %v388_v23 = vrot.slane %v2677_v20, 4  ;;  %v1862_v37 = vcombine.low %v2674_v18, %v2677_v20  ;;  %v497_v41 = vshrl.u32 %v2674_v18, 16 }
  0x39   : > { %2062 = vmatpush3.bf16.msra.mxu0 %v2262_v29  ;;  %1520 = vmatmul.mubr.bf16.gmra.mrb[8].mxu1 %v1869_v21  ;;  %v500_v29 = vshll.u32 %v2674_v18, 16  ;;  %v511_v44 = vshrl.u32 %v2677_v20, 16  ;;  %v514_v45 = vshll.u32 %v2677_v20, 16  ;;  %v770_v21 = vshll.u32 %v352_v40, 16 }
  0x3a   : > { %2063 = vmatprep.subr.bf16.mxu0 %v2264_v54  ;;  %v1866_v35 = vcombine.low %v387_v22, %v388_v23  ;;  %1527 = vmatprep.mubr.bf16.mxu1 %v1874_v30  ;;  %v499_v46 = vrot.slane %v497_v41, 4  ;;  %v2269_v54 = vld [vmem:[%s2893_s2 + $0x1f0] sm:$0xff]  }
  0x3b   : > { %2102 = vmatpush3.bf16.msra.mxu1 %v2263_v49  ;;  %v761_v49 = vshrl.u32 %v2708_v38, 16  ;;  %v502_v55 = vrot.slane %v500_v29, 5  ;;  %v513_v56 = vrot.slane %v511_v44, 4  ;;  %v2271_v29 = vld [vmem:[%s2893_s2 + $0x1b0] sm:$0xff]  }
  0x3c   : > { %2103 = vmatprep.subr.bf16.mxu1 %v2265_v57  ;;  %1462 = vmatprep.mubr.bf16.mxu0 %v1866_v35  ;;  %v516_v57 = vrot.slane %v514_v45, 5  ;;  %v2270_v35 = vld [vmem:[%s2893_s2 + $0x130] sm:$0xff]   ;;  %v2272_v45 = vld [vmem:[%s2893_s2 + $0x178] sm:$0xff]  }
  0x3d   : > { %2064 = vmatpush3.bf16.msra.mxu0 %v2266_v58  ;;  %v574_v58 = vrot.slane %v2522_v16, 4  ;;  %v763_v60 = vrot.slane %v761_v49, 4  ;;  %v503_v26 = vor.u32 %v502_v55, %v499_v46  ;;  %v2273_v49 = vld [vmem:[%s2893_s2 + $0x1f8] sm:$0xff]  }
  0x3e   : > { %2065 = vmatprep.subr.bf16.mxu0 %v2268_v51  ;;  %v517_v30 = vor.u32 %v516_v57, %v513_v56  ;;  %v659_v51 = vrot.slane %v657_v52, 4  ;;  %v2274_v56 = vld [vmem:[%s2893_s2 + $0x138] sm:$0xff]   ;;  %v662_v57 = vrot.slane %v660_v61, 5  ;;  %v1875_v61 = vcombine.low %v572_v42, %v573_v48 }
  0x3f   : > { %2104 = vmatpush3.bf16.msra.mxu1 %v2267_v5  ;;  %v766_v5 = vrot.slane %v764_v50, 5  ;;  %v504_v43 = vrot.slane %v503_v26, 4  ;;  %v1887_v50 = vcombine.low %v382_v36, %v383_v14  ;;  %v2275_v36 = vld [vmem:[%s2893_s2 + $0x1b8] sm:$0xff]   ;;  %v676_v26 = vrot.slane %v674_v27, 5 }
  0x40   : > { %1463 = vmatmul.mubr.bf16.gmra.mrb[12].mxu0 %v1862_v37  ;;  %2105 = vmatprep.subr.bf16.mxu1 %v2269_v54  ;;  %v2726_v37 = vrot.slane %v770_v21, 5  ;;  %v518_v44 = vrot.slane %v517_v30, 4  ;;  %v322_v14 = vld [vmem:[%s2449_s12 + $0x18] sm:$0x11]  ;;  %v2276_v21 = vld [vmem:[%s2893_s2 + $0x200] sm:$0xff]   ;;  %v688_v30 = vshll.u32 %v2688_v24, 16  ;;  %v1883_v42 = vcombine.low %v2459_v33, %v2514_v12 }
  0x41   : > { %v767_v41 = vor.u32 %v766_v5, %v763_v60  ;;  %2066 = vmatpush3.bf16.msra.mxu0 %v2270_v35  ;;  %v2738_v46 = vsel %vm2498_vm2, %v504_v43, %v508_v59  ;;  %v326_v52 = vld [vmem:[%s2449_s12 + $0x38] sm:$0x11]  ;;  %v673_v59 = vrot.slane %v671_v62, 4  ;;  %v610_v60 = vshll.u32 %v322_v14, 16 }
  0x42   : > { %v2742_v47 = vsel %vm2498_vm2, %v518_v44, %v522_v31  ;;  %2067 = vmatprep.subr.bf16.mxu0 %v2272_v45  ;;  %v624_v5 = vshll.u32 %v326_v52, 16  ;;  %v685_v62 = vshrl.u32 %v2688_v24, 16  ;;  %v334_v48 = vld [vmem:[%s2449_s12 + $0x78] sm:$0x11] }
  0x43   : > { %v2731_v40 = vrot.slane %v767_v41, 4  ;;  %2106 = vmatpush3.bf16.msra.mxu1 %v2271_v29  ;;  %v1870_v54 = vcombine.low %v2738_v46, %v2742_v47  ;;  %v612_v31 = vrot.slane %v610_v60, 5  ;;  %v638_v41 = vshll.u32 %v330_v39, 16  ;;  %v338_v12 = vld [vmem:[%s2449_s12 + $0x98] sm:$0x11] }
  0x44   : > { %2107 = vmatprep.subr.bf16.mxu1 %v2273_v49  ;;  %v626_v35 = vrot.slane %v624_v5, 5  ;;  %v663_v29 = vor.u32 %v662_v57, %v659_v51  ;;  %v652_v44 = vshll.u32 %v334_v48, 16  ;;  %v677_v45 = vor.u32 %v676_v26, %v673_v59  ;;  %v342_v57 = vld [vmem:[%s2449_s12 + $0xb8] sm:$0x11] }
  0x45   : > { %v773_v55 = vsel %vm2498_vm2, %v2731_v40, %v2726_v37  ;;  %1528 = vmatmul.mubr.bf16.gmra.mrb[12].mxu1 %v1870_v54  ;;  %2068 = vmatpush3.bf16.msra.mxu0 %v2274_v56  ;;  %v613_v27 = vsel %vm2498_vm2, %v2598_v3, %v612_v31  ;;  %v702_v49 = vshll.u32 %v2691_v25, 16  ;;  %v640_v33 = vrot.slane %v638_v41, 5  ;;  %v2277_v54 = vld [vmem:[%s2893_s2 + $0x208] sm:$0xff]   ;;  %v350_v31 = vld [vmem:[%s2449_s12 + $0xf8] sm:$0x11] }
  0x46   : > { %1633 = vmatprep.mubr.bf16.mxu1 %v1887_v50  ;;  %2145 = vmatprep.subr.bf16.mxu0 %v2276_v21  ;;  %v627_v43 = vsel %vm2498_vm2, %v2600_v4, %v626_v35  ;;  %v654_v51 = vrot.slane %v652_v44, 5  ;;  %v575_v56 = vrot.slane %v2525_v17, 4  ;;  %v666_v3 = vshll.u32 %v338_v12, 16  ;;  %v2279_v16 = vld [vmem:[%s2893_s2 + $0x218] sm:$0xff]  }
  0x47   : > { %2108 = vmatpush3.bf16.msra.mxu1 %v2275_v36  ;;  %v1879_v50 = vcombine.low %v613_v27, %v627_v43  ;;  %v641_v4 = vsel %vm2498_vm2, %v2698_v32, %v640_v33  ;;  %v1888_v36 = vcombine.low %v384_v15, %v385_v7  ;;  %v664_v14 = vrot.slane %v663_v29, 4  ;;  %v346_v32 = vld [vmem:[%s2449_s12 + $0xd8] sm:$0x11]  ;;  %v2278_v15 = vld [vmem:[%s2893_s2 + $0x210] sm:$0xff]   ;;  %v2281_v33 = vld [vmem:[%s2893_s2 + $0x228] sm:$0xff]  }
  0x48   : > { %2169 = vmatprep.subr.bf16.mxu1 %v2276_v21  ;;  %v680_v52 = vshll.u32 %v342_v57, 16  ;;  %v655_v17 = vsel %vm2498_vm2, %v2700_v28, %v654_v51  ;;  %v668_v59 = vrot.slane %v666_v3, 5  ;;  %v678_v60 = vrot.slane %v677_v45, 4  ;;  %v2282_v51 = vld [vmem:[%s2893_s2 + $0x230] sm:$0xff]  }
  0x49   : > { %1568 = vmatprep.mubr.bf16.mxu0 %v1879_v50  ;;  %v1880_v5 = vcombine.low %v641_v4, %v655_v17  ;;  %v687_v35 = vrot.slane %v685_v62, 4  ;;  %v690_v7 = vrot.slane %v688_v30, 5  ;;  %v1876_v28 = vcombine.low %v574_v58, %v575_v56 }
  0x4a   : > { %1569 = vmatmul.mubr.bf16.vlgmr.msra.gmra.mrb[16].mxu0 %v1875_v61  ;;  %v682_v26 = vrot.slane %v680_v52, 5  ;;  %v701_v61 = vrot.slane %v699_v34, 4  ;;  %v669_v39 = vsel %vm2498_vm2, %v664_v14, %v668_v59  ;;  %v704_v62 = vrot.slane %v702_v49, 5  ;;  %v2280_v49 = vld [vmem:[%s2893_s2 + $0x220] sm:$0xff]  }
  0x4b   : > { %2146 = vmatpush3.bf16.msra.mxu0 %v2276_v21  ;;  %1576 = vmatprep.mubr.bf16.mxu0 %v1880_v5  ;;  %v691_v48 = vor.u32 %v690_v7, %v687_v35  ;;  %v694_v41 = vshll.u32 %v346_v32, 16  ;;  %v708_v29 = vshll.u32 %v350_v31, 16  ;;  %v576_v58 = vrot.slane %v2611_v9, 4 }
  0x4c   : > { %2147 = vmatprep.subr.bf16.mxu0 %v2277_v54  ;;  %v705_v30 = vor.u32 %v704_v62, %v701_v61  ;;  %v577_v34 = vrot.slane %v2614_v10, 4  ;;  %v1885_v10 = vcombine.low %v2592_v1, %v2674_v18  ;;  %v578_v1 = vrot.slane %v2688_v24, 4  ;;  %v2283_v24 = vld [vmem:[%s2893_s2 + $0x238] sm:$0xff]  }
  0x4d   : > { %1634 = vmatmul.mubr.bf16.vlgmr.msra.gmra.mrb[16].mxu1 %v1883_v42  ;;  %v683_v42 = vsel %vm2498_vm2, %v678_v60, %v682_v26  ;;  %v692_v27 = vrot.slane %v691_v48, 4  ;;  %v696_v43 = vrot.slane %v694_v41, 5  ;;  %v710_v45 = vrot.slane %v708_v29, 5 }
  0x4e   : > { %2177 = vmatpush3.bf16.msra.mxu1 %v2276_v21  ;;  %1641 = vmatprep.mubr.bf16.mxu1 %v1888_v36  ;;  %v1884_v21 = vcombine.low %v2517_v13, %v2589_v0  ;;  %v1881_v13 = vcombine.low %v669_v39, %v683_v42  ;;  %v1889_v0 = vcombine.low %v386_v8, %v387_v22  ;;  %v706_v44 = vrot.slane %v705_v30, 4 }
  0x4f   : > { %2170 = vmatprep.subr.bf16.mxu1 %v2277_v54  ;;  %2148 = vmatpush3.bf16.msra.mxu0 %v2277_v54  ;;  %v746_v8 = vrot.slane %v2708_v38, 4  ;;  %v1877_v9 = vcombine.low %v576_v58, %v577_v34  ;;  %v697_v22 = vsel %vm2498_vm2, %v692_v27, %v696_v43  ;;  %v579_v18 = vrot.slane %v2691_v25, 4 }
  0x50   : > { %2149 = vmatprep.subr.bf16.mxu0 %v2278_v15  ;;  %v711_v50 = vsel %vm2498_vm2, %v706_v44, %v710_v45  ;;  %v1891_v25 = vcombine.low %v2530_v19, %v2586_v63  ;;  %v1893_v57 = vcombine.low %v2668_v11, %v2738_v46  ;;  %v1894_v19 = vcombine.low %v2742_v47, %v773_v55 }
  0x51   : > { %v1882_v12 = vcombine.low %v697_v22, %v711_v50  ;;  %v1878_v56 = vcombine.low %v578_v1, %v579_v18 }
  0x52   : > { %2178 = vmatpush3.bf16.msra.mxu1 %v2277_v54  ;;  %1577 = vmatmul.mubr.bf16.gmra.mrb[20].mxu0 %v1876_v28  ;;  %v1890_v54 = vcombine.low %v388_v23, %v746_v8  ;;  %v1886_v23 = vcombine.low %v2677_v20, %v2708_v38  ;;  %v1892_v20 = vcombine.low %v2606_v6, %v2664_v53  ;;  %v1895_v6 = vld [vmem:[%s2894_s3] ss:$0 sm:$0xff] }
  0x53   : > { %2171 = vmatprep.subr.bf16.mxu1 %v2278_v15  ;;  %2150 = vmatpush3.bf16.msra.mxu0 %v2278_v15 }
  0x54   : > { %2151 = vmatprep.subr.bf16.mxu0 %v2279_v16  ;;  %1584 = vmatprep.mubr.bf16.mxu0 %v1881_v13 }
  0x55   : > { %1642 = vmatmul.mubr.bf16.gmra.mrb[20].mxu1 %v1884_v21 }
  0x56   : > { %2179 = vmatpush3.bf16.msra.mxu1 %v2278_v15  ;;  %1649 = vmatprep.mubr.bf16.mxu1 %v1889_v0 }
  0x57   : > { %2172 = vmatprep.subr.bf16.mxu1 %v2279_v16  ;;  %2152 = vmatpush3.bf16.msra.mxu0 %v2279_v16 }
  0x58   : > { %2153 = vmatprep.subr.bf16.mxu0 %v2280_v49 }
  0x5a   : > { %2180 = vmatpush3.bf16.msra.mxu1 %v2279_v16  ;;  %1585 = vmatmul.mubr.bf16.gmra.mrb[24].mxu0 %v1877_v9 }
  0x5b   : > { %2173 = vmatprep.subr.bf16.mxu1 %v2280_v49  ;;  %2154 = vmatpush3.bf16.msra.mxu0 %v2280_v49 }
  0x5c   : > { %2155 = vmatprep.subr.bf16.mxu0 %v2281_v33  ;;  %1592 = vmatprep.mubr.bf16.mxu0 %v1882_v12 }
  0x5d   : > { %1650 = vmatmul.mubr.bf16.gmra.mrb[24].mxu1 %v1885_v10 }
  0x5e   : > { %2181 = vmatpush3.bf16.msra.mxu1 %v2280_v49  ;;  %1657 = vmatprep.mubr.bf16.mxu1 %v1890_v54 }
  0x5f   : > { %2174 = vmatprep.subr.bf16.mxu1 %v2281_v33  ;;  %2156 = vmatpush3.bf16.msra.mxu0 %v2281_v33 }
  0x60   : > { %2157 = vmatprep.subr.bf16.mxu0 %v2282_v51 }
  0x62   : > { %2182 = vmatpush3.bf16.msra.mxu1 %v2281_v33  ;;  %1593 = vmatmul.mubr.bf16.gmra.mrb[28].mxu0 %v1878_v56 }
  0x63   : > { %2175 = vmatprep.subr.bf16.mxu1 %v2282_v51  ;;  %2158 = vmatpush3.bf16.msra.mxu0 %v2282_v51 }
  0x64   : > { %2159 = vmatprep.subr.bf16.mxu0 %v2283_v24  ;;  %2161 = vmatprep.mubr.bf16.mxu0 %v1891_v25 }
  0x65   : > { %1658 = vmatmul.mubr.bf16.gmra.mrb[28].mxu1 %v1886_v23 }
  0x66   : > { %2183 = vmatpush3.bf16.msra.mxu1 %v2282_v51  ;;  %2165 = vmatprep.mubr.bf16.mxu1 %v1893_v57 }
  0x67   : > { %2176 = vmatprep.subr.bf16.mxu1 %v2283_v24  ;;  %2160 = vmatpush3.bf16.msra.mxu0 %v2283_v24 }
  0x6a   : > { %2184 = vmatpush3.bf16.msra.mxu1 %v2283_v24  ;;  %2162 = vmatmul.mubr.bf16.vlgmr.msra.gmra.mrb[32].mxu0 %v1892_v20 }
  0x6d   : > { %2166 = vmatmul.mubr.bf16.vlgmr.msra.gmra.mrb[32].mxu1 %v1894_v19 }
  0xfb   : > { %v1989_v63 = vpop.f32.mrb[0].mxu0 }
  0xfc   : > { %v1990_v11 = vpop.f32.mrb[1].mxu0  ;;  %v2029_v2 = vpop.f32.mrb[0].mxu1 }
  0xfd   : > { %v1991_v38 = vadd.f32 %v1990_v11, %v1989_v63  ;;  %v1992_v46 = vpop.f32.mrb[2].mxu0  ;;  %v2030_v36 = vpop.f32.mrb[1].mxu1 }
  0xfe   : > { %v1993_v3 = vpop.f32.mrb[3].mxu0  ;;  %v2031_v37 = vadd.f32 %v2030_v36, %v2029_v2  ;;  %v2032_v40 = vpop.f32.mrb[2].mxu1 }
  0xff   : > { %v1994_v4 = vadd.f32 %v1993_v3, %v1992_v46  ;;  %v1441_v53 = vadd.f32 %v1991_v38, %v1895_v6  ;;  %v2033_v14 = vpop.f32.mrb[3].mxu1 }
 0x100   : > { %v2034_v59 = vadd.f32 %v2033_v14, %v2032_v40 }
 0x101   : > { %v1444_v47 = vadd.f32 %v1994_v4, %v1895_v6  ;;  %v1506_v17 = vadd.f32 %v2031_v37, %v1441_v53 }
 0x103   : > { %v1995_v55 = vpop.f32.mrb[4].mxu0  ;;  %v1509_v32 = vadd.f32 %v2034_v59, %v1444_v47 }
 0x104   : > { %v1996_v52 = vpop.f32.mrb[5].mxu0  ;;  %v2035_v35 = vpop.f32.mrb[4].mxu1 }
 0x105   : > { %v1997_v60 = vadd.f32 %v1996_v52, %v1995_v55  ;;  %v1998_v5 = vpop.f32.mrb[6].mxu0  ;;  %v2036_v7 = vpop.f32.mrb[5].mxu1 }
 0x106   : > { %v1999_v26 = vpop.f32.mrb[7].mxu0  ;;  %v2037_v61 = vadd.f32 %v2036_v7, %v2035_v35  ;;  %v2038_v28 = vpop.f32.mrb[6].mxu1 }
 0x107   : > { %v2000_v31 = vadd.f32 %v1999_v26, %v1998_v5  ;;  %v1449_v15 = vadd.f32 %v1997_v60, %v1895_v6  ;;  %v2039_v62 = vpop.f32.mrb[7].mxu1 }
 0x108   : > { %v2040_v41 = vadd.f32 %v2039_v62, %v2038_v28 }
 0x109   : > { %v1452_v21 = vadd.f32 %v2000_v31, %v1895_v6  ;;  %v1514_v48 = vadd.f32 %v2037_v61, %v1449_v15 }
 0x10b   : > { %v2001_v39 = vpop.f32.mrb[8].mxu0  ;;  %v1517_v13 = vadd.f32 %v2040_v41, %v1452_v21 }
 0x10c   : > { %v2002_v42 = vpop.f32.mrb[9].mxu0  ;;  %v2041_v58 = vpop.f32.mrb[8].mxu1 }
 0x10d   : > { %v2003_v29 = vadd.f32 %v2002_v42, %v2001_v39  ;;  %v2004_v30 = vpop.f32.mrb[10].mxu0  ;;  %v2042_v27 = vpop.f32.mrb[9].mxu1 }
 0x10e   : > { %v2005_v16 = vpop.f32.mrb[11].mxu0  ;;  %v2043_v43 = vadd.f32 %v2042_v27, %v2041_v58  ;;  %v2044_v44 = vpop.f32.mrb[10].mxu1 }
 0x10f   : > { %v2006_v0 = vadd.f32 %v2005_v16, %v2004_v30  ;;  %v1457_v34 = vadd.f32 %v2003_v29, %v1895_v6  ;;  %v2045_v49 = vpop.f32.mrb[11].mxu1 }
 0x110   : > { %v2046_v10 = vadd.f32 %v2045_v49, %v2044_v44 }
 0x111   : > { %v1460_v45 = vadd.f32 %v2006_v0, %v1895_v6  ;;  %v1522_v9 = vadd.f32 %v2043_v43, %v1457_v34 }
 0x113   : > { %v2007_v8 = vpop.f32.mrb[12].mxu0  ;;  %v1525_v12 = vadd.f32 %v2046_v10, %v1460_v45 }
 0x114   : > { %v2008_v22 = vpop.f32.mrb[13].mxu0 }
 0x115   : > { %v2009_v50 = vadd.f32 %v2008_v22, %v2007_v8  ;;  %v2010_v33 = vpop.f32.mrb[14].mxu0 }
 0x116   : > { %v2011_v54 = vpop.f32.mrb[15].mxu0 }
 0x117   : > { %v2012_v1 = vadd.f32 %v2011_v54, %v2010_v33  ;;  %v1465_v51 = vadd.f32 %v2009_v50, %v1895_v6 }
 0x118   : > { %v2047_v18 = vpop.f32.mrb[12].mxu1 }
 0x119   : > { %v2048_v56 = vpop.f32.mrb[13].mxu1  ;;  %v1468_v25 = vadd.f32 %v2012_v1, %v1895_v6 }
 0x11a   : > { %v2049_v23 = vadd.f32 %v2048_v56, %v2047_v18  ;;  %v2050_v24 = vpop.f32.mrb[14].mxu1 }
 0x11b   : > { %v2051_v57 = vpop.f32.mrb[15].mxu1 }
 0x11c   : > { %v1530_v20 = vadd.f32 %v2049_v23, %v1465_v51  ;;  %v2052_v19 = vadd.f32 %v2051_v57, %v2050_v24 }
 0x11d   : > { %v2069_v11 = vpop.f32.mrb[16].mxu0 }
 0x11e   : > { %v2872_v63 = vadd.f32 %v2052_v19, %v1468_v25  ;;  %v2070_v46 = vpop.f32.mrb[17].mxu0 }
 0x11f   : > { %v2071_v4 = vadd.f32 %v2070_v46, %v2069_v11  ;;  %v2072_v53 = vpop.f32.mrb[18].mxu0 }
 0x120   : > { %v2109_v38 = vpop.f32.mrb[16].mxu1  ;;  %v2073_v37 = vpop.f32.mrb[19].mxu0 }
 0x121   : > { %v2110_v3 = vpop.f32.mrb[17].mxu1  ;;  %v1571_v47 = vadd.f32 %v2071_v4, %v1506_v17  ;;  %v2074_v55 = vadd.f32 %v2073_v37, %v2072_v53 }
 0x122   : > { %v2111_v2 = vadd.f32 %v2110_v3, %v2109_v38  ;;  %v2112_v36 = vpop.f32.mrb[18].mxu1 }
 0x123   : > { %v2113_v40 = vpop.f32.mrb[19].mxu1  ;;  %v1574_v52 = vadd.f32 %v2074_v55, %v1509_v32 }
 0x124   : > { %v2114_v14 = vadd.f32 %v2113_v40, %v2112_v36  ;;  %v1636_v6 = vadd.f32 %v2111_v2, %v1571_v47 }
 0x125   : > { %v2075_v59 = vpop.f32.mrb[20].mxu0 }
 0x126   : > { %v2874_v5 = vadd.f32 %v2114_v14, %v1574_v52  ;;  %v2076_v26 = vpop.f32.mrb[21].mxu0 }
 0x127   : > { %v2077_v35 = vadd.f32 %v2076_v26, %v2075_v59  ;;  %v2078_v7 = vpop.f32.mrb[22].mxu0 }
 0x128   : > { %v2115_v60 = vpop.f32.mrb[20].mxu1  ;;  %v2079_v28 = vpop.f32.mrb[23].mxu0 }
 0x129   : > { %v2116_v31 = vpop.f32.mrb[21].mxu1  ;;  %v1579_v39 = vadd.f32 %v2077_v35, %v1514_v48  ;;  %v2080_v62 = vadd.f32 %v2079_v28, %v2078_v7 }
 0x12a   : > { %v2117_v15 = vadd.f32 %v2116_v31, %v2115_v60  ;;  %v2118_v61 = vpop.f32.mrb[22].mxu1 }
 0x12b   : > { %v2119_v21 = vpop.f32.mrb[23].mxu1  ;;  %v1582_v17 = vadd.f32 %v2080_v62, %v1517_v13 }
 0x12c   : > { %v2120_v42 = vadd.f32 %v2119_v21, %v2118_v61  ;;  %v1644_v41 = vadd.f32 %v2117_v15, %v1579_v39 }
 0x12d   : > { %v2081_v29 = vpop.f32.mrb[24].mxu0 }
 0x12e   : > { %v1647_v30 = vadd.f32 %v2120_v42, %v1582_v17  ;;  %v2082_v16 = vpop.f32.mrb[25].mxu0 }
 0x12f   : > { %v2083_v58 = vadd.f32 %v2082_v16, %v2081_v29  ;;  %v2084_v27 = vpop.f32.mrb[26].mxu0 }
 0x130   : > { %v2121_v32 = vpop.f32.mrb[24].mxu1  ;;  %v2085_v44 = vpop.f32.mrb[27].mxu0 }
 0x131   : > { %v2122_v0 = vpop.f32.mrb[25].mxu1  ;;  %v1587_v49 = vadd.f32 %v2083_v58, %v1522_v9  ;;  %v2086_v8 = vadd.f32 %v2085_v44, %v2084_v27 }
 0x132   : > { %v2123_v34 = vadd.f32 %v2122_v0, %v2121_v32  ;;  %v2124_v43 = vpop.f32.mrb[26].mxu1 }
 0x133   : > { %v2125_v45 = vpop.f32.mrb[27].mxu1  ;;  %v1590_v22 = vadd.f32 %v2086_v8, %v1525_v12 }
 0x134   : > { %v2126_v10 = vadd.f32 %v2125_v45, %v2124_v43  ;;  %v1652_v48 = vadd.f32 %v2123_v34, %v1587_v49 }
 0x135   : > { %v2087_v50 = vpop.f32.mrb[28].mxu0 }
 0x136   : > { %v1655_v33 = vadd.f32 %v2126_v10, %v1590_v22  ;;  %v2088_v54 = vpop.f32.mrb[29].mxu0 }
 0x137   : > { %v2089_v18 = vadd.f32 %v2088_v54, %v2087_v50  ;;  %v2090_v56 = vpop.f32.mrb[30].mxu0 }
 0x138   : > { %v2127_v13 = vpop.f32.mrb[28].mxu1  ;;  %v2091_v24 = vpop.f32.mrb[31].mxu0 }
 0x139   : > { %v2128_v1 = vpop.f32.mrb[29].mxu1  ;;  %v1595_v57 = vadd.f32 %v2089_v18, %v1530_v20  ;;  %v2092_v19 = vadd.f32 %v2091_v24, %v2090_v56 }
 0x13a   : > { %v2129_v51 = vadd.f32 %v2128_v1, %v2127_v13  ;;  %v2130_v23 = vpop.f32.mrb[30].mxu1 }
 0x13b   : > { %v2131_v25 = vpop.f32.mrb[31].mxu1  ;;  %v1598_v9 = vadd.f32 %v2092_v19, %v2872_v63 }
 0x13c   : > { %v2132_v11 = vadd.f32 %v2131_v25, %v2130_v23  ;;  %v1660_v12 = vadd.f32 %v2129_v51, %v1595_v57 }
 0x13d   : > { %v2163_v38 = vpop.f32.mrb[32].mxu0 }
 0x13e   : > { %v1663_v3 = vadd.f32 %v2132_v11, %v1598_v9  ;;  %v1709_v4 = vadd.f32 %v2163_v38, %v1644_v41  ;;  %v1700_v53 = vpop.f32.mrb[33].mxu0 }
 0x13f   : > { %v1701_v37 = vadd.f32 %v1700_v53, %v1636_v6  ;;  %v2164_v20 = vpop.f32.mrb[34].mxu0 }
 0x140   : > { %v2167_v46 = vpop.f32.mrb[32].mxu1  ;;  %1733 = vst [vmem:[%s316_s26 + $0x10] sm:$0xff] %v1709_v4  ;;  %v1712_v55 = vadd.f32 %v2164_v20, %v1647_v30  ;;  %v1703_v14 = vpop.f32.mrb[35].mxu0 }
 0x141   : > { %v1725_v2 = vadd.f32 %v2167_v46, %v1660_v12  ;;  %v1716_v36 = vpop.f32.mrb[33].mxu1  ;;  %1731 = vst [vmem:[%s316_s26] sm:$0xff] %v1701_v37  ;;  %v1704_v59 = vadd.f32 %v1703_v14, %v2874_v5 }
 0x142   : > { %v1717_v40 = vadd.f32 %v1716_v36, %v1652_v48  ;;  %v2168_v47 = vpop.f32.mrb[34].mxu1  ;;  %1734 = vst [vmem:[%s316_s26 + $0x18] sm:$0xff] %v1712_v55 }
 0x143   : > { %1737 = vst [vmem:[%s316_s26 + $0x30] sm:$0xff] %v1725_v2  ;;  %v1728_v63 = vadd.f32 %v2168_v47, %v1663_v3  ;;  %v1719_v52 = vpop.f32.mrb[35].mxu1  ;;  %1732 = vst [vmem:[%s316_s26 + $0x8] sm:$0xff] %v1704_v59 }
 0x144   : > { %1735 = vst [vmem:[%s316_s26 + $0x20] sm:$0xff] %v1717_v40  ;;  %v1720_v60 = vadd.f32 %v1719_v52, %v1655_v33 }
 0x145   : > { %1738 = vst [vmem:[%s316_s26 + $0x38] sm:$0xff] %v1728_v63 }
 0x146   : > { %1736 = vst [vmem:[%s316_s26 + $0x28] sm:$0xff] %v1720_v60 }
 0x147 PF: > { %s14_s17 = sadd.s32 1, %s2306_s17   ;;  %s2898_s15 = smov %s2302_s16 }
 0x148   : > { %p11_p5 = scmp.ge.s32.totalorder %s14_s17, 4   ;;  %s2899_s16 = smov %s2901_s18 }
 0x14a   :  { %13 = sbr.rel (!%p11_p5) target bundleno = 2 (0x2), region = 69 }

</bundles_post_ra>
